<compile_context>
chip_gen: v7x
topology: tpu7x:2x2x1
jax: 0.10.0
libtpu: 0.0.40
codegen_flags: <defaults>
</compile_context>

<pallas_src>
import functools

import jax
import jax.numpy as jnp
from jax.experimental import pallas as pl
from jax.experimental.pallas import tpu as pltpu


def _dice_partial_kernel(x_ref, t_ref, inter_ref, osum_ref, tsum_ref, *,
                         n_valid, s_tile, nt_per_split, need_mask):
    n = pl.program_id(2)

    @pl.when(n == 0)
    def _():
        inter_ref[...] = jnp.zeros_like(inter_ref)
        osum_ref[...] = jnp.zeros_like(osum_ref)
        tsum_ref[...] = jnp.zeros_like(tsum_ref)

    x = x_ref[0].astype(jnp.float32)           # (C, s_tile, 128) upcast in-kernel
    t = t_ref[0].astype(jnp.int32)             # (s_tile, 128) labels
    c = x.shape[0]

    if need_mask:
        # Global pixel index of every element of this tile.
        g = pl.program_id(1) * nt_per_split + n              # global tile index
        row = jax.lax.broadcasted_iota(jnp.int32, (s_tile, 128), 0)
        lane = jax.lax.broadcasted_iota(jnp.int32, (s_tile, 128), 1)
        pix = (g * s_tile + row) * 128 + lane
        valid = pix < n_valid
        # Mask logits BEFORE exp: ragged-tail data is unspecified and could be
        # non-finite; 0 keeps the softmax finite and the pixels are dropped
        # below via inv / t anyway.
        x = jnp.where(valid[None], x, 0.0)
        t = jnp.where(valid, t, c)             # out-of-range class -> no one-hot hit

    # Channel-axis softmax: channels are the leading dim, so every reduction /
    # broadcast here is C(-1) full-vreg VPU ops (no per-pixel XLU sublane work).
    m = jnp.max(x, axis=0)                                   # (s_tile, 128)
    e = jnp.exp(x - m[None])                                 # (C, s_tile, 128)
    inv = 1.0 / jnp.sum(e, axis=0)                           # one divide per pixel
    if need_mask:
        inv = jnp.where(valid, inv, 0.0)                     # zeroes p on padded lanes
    p = e * inv[None]                                        # (C, s_tile, 128)

    # One-hot via selects (no explicit one-hot tensor + multiplies).
    onehot = jax.lax.broadcasted_iota(jnp.int32, (c, s_tile, 128), 0) == t[None]

    # Lane-dense accumulation: fold the spatial tile down to (C, r, 128) with
    # pure elementwise adds and accumulate into the resident output block.
    # The cross-lane/sublane reduction happens once, in the JAX epilogue.
    r = inter_ref.shape[3]
    groups = s_tile // r

    def fold(a):                                             # (C,s,128)->(C,r,128)
        return jnp.sum(a.reshape(c, groups, r, 128), axis=1)

    inter_ref[0, 0] += fold(jnp.where(onehot, p, 0.0))
    osum_ref[0, 0] += fold(p)
    tsum_ref[0, 0] += fold(jnp.where(onehot, 1.0, 0.0))


def _pick_s_tile(s_rows, c, x_itemsize, t_itemsize):
    """Rows (of 128 pixels) per grid step.  Budget covers the double-buffered
    input blocks plus the in-kernel f32 working set (~4 f32 temporaries per
    channel + a handful of per-pixel temps), staying well under the 32 MiB
    scoped VMEM (v7x-safe) while keeping steps large enough to amortize the
    per-step pipeline overhead."""
    per_row = 2 * 128 * (c * x_itemsize + t_itemsize) + 128 * 4 * (4 * c + 8)
    budget = 16 * 1024 * 1024
    st = (budget // per_row) // 32 * 32        # x32: 8-bit label native tiling
    st = max(32, st)
    return s_rows if st >= s_rows else st


def dice_loss(outputs, targets, smooth=1e-6, s_tile=None, n_splits=None):
    """outputs: (B, C, H, W) float logits (f32 or bf16);
    targets: (B, H, W) (or (B, 1, H, W)) integer class ids.
    Returns scalar 1 - mean(dice), matching the PyTorch DiceLoss forward."""
    B, C, H, W = outputs.shape
    N = H * W
    S = -(-N // 128)                 # rows of 128 pixels
    N128 = S * 128

    x = outputs.reshape(B, C, N)     # keep native dtype; upcast in-kernel
    t = targets.reshape(B, N)

    # Narrow integer labels: targets are pure HBM traffic.
    if C <= 127:
        tgt_dt = jnp.int8
    elif C <= 32767:
        tgt_dt = jnp.int16
    else:
        tgt_dt = jnp.int32
    if (not jnp.issubdtype(t.dtype, jnp.integer)
            or t.dtype.itemsize > jnp.dtype(tgt_dt).itemsize):
        t = t.astype(tgt_dt)

    # Pad only to the next multiple of 128 pixels (usually a no-op; most
    # segmentation H*W are already multiples of 128).  Pad value is irrelevant:
    # padded pixels are masked in-kernel by the global pixel index.
    if N128 != N:
        x = jnp.pad(x, ((0, 0), (0, 0), (0, N128 - N)))
        t = jnp.pad(t, ((0, 0), (0, N128 - N)))

    # Free re-layout: pixels fill sublanes AND lanes; channels lead.
    x = x.reshape(B, C, S, 128)
    t = t.reshape(B, S, 128)

    if s_tile is None:
        s_tile = _pick_s_tile(S, C, x.dtype.itemsize, t.dtype.itemsize)
    else:
        s_tile = int(s_tile)
        if s_tile < S:
            s_tile = max(32, s_tile // 32 * 32)
        s_tile = min(s_tile, S)

    num_nt = -(-S // s_tile)
    if n_splits is None:
        n_splits = 2 if B == 1 else 1            # keep both v7x TCs busy at B=1
    n_splits = max(1, min(int(n_splits), num_nt))
    nt_per_split = -(-num_nt // n_splits)

    overhang = (n_splits * nt_per_split != num_nt)
    need_mask = (N128 != N) or (S % s_tile != 0) or overhang

    r = 8 if s_tile % 8 == 0 else s_tile         # accumulator sublane rows

    last = num_nt - 1
    if overhang:
        def g_of(sp, n):
            return jnp.minimum(sp * nt_per_split + n, last)
    else:
        def g_of(sp, n):
            return sp * nt_per_split + n

    def x_map(b, sp, n):
        return (b, 0, g_of(sp, n), 0)

    def t_map(b, sp, n):
        return (b, g_of(sp, n), 0)

    def o_map(b, sp, n):
        return (b, sp, 0, 0, 0)

    kernel = functools.partial(
        _dice_partial_kernel, n_valid=N, s_tile=s_tile,
        nt_per_split=nt_per_split, need_mask=need_mask)

    part_shape = jax.ShapeDtypeStruct((B, n_splits, C, r, 128), jnp.float32)
    o_spec = pl.BlockSpec((1, 1, C, r, 128), o_map)

    inter_p, osum_p, tsum_p = pl.pallas_call(
        kernel,
        out_shape=(part_shape, part_shape, part_shape),
        grid_spec=pltpu.PrefetchScalarGridSpec(
            num_scalar_prefetch=0,
            grid=(B, n_splits, nt_per_split),
            in_specs=[
                pl.BlockSpec((1, C, s_tile, 128), x_map),
                pl.BlockSpec((1, s_tile, 128), t_map),
            ],
            out_specs=[o_spec, o_spec, o_spec],
        ),
        compiler_params=pltpu.CompilerParams(
            dimension_semantics=("parallel", "parallel", "arbitrary"),
            vmem_limit_bytes=32 * 1024 * 1024),
    )(x, t)

    # Tiny epilogue: cross-lane/split reduction + dice + mean in plain JAX.
    inter = jnp.sum(inter_p, axis=(1, 3, 4))     # (B, C)
    osum = jnp.sum(osum_p, axis=(1, 3, 4))
    tsum = jnp.sum(tsum_p, axis=(1, 3, 4))
    dice = (2.0 * inter + float(smooth)) / (osum + tsum + float(smooth))
    return 1.0 - jnp.mean(dice)


def _dice_loss_ref(outputs, targets, smooth=1e-6):
    """Pure-JAX reference mirroring the PyTorch forward."""
    B, C, H, W = outputs.shape
    p = jax.nn.softmax(outputs.astype(jnp.float32), axis=1).reshape(B, C, -1)
    t = targets.reshape(B, 1, -1)
    onehot = (jnp.arange(C).reshape(1, C, 1) == t).astype(jnp.float32)
    inter = jnp.sum(p * onehot, axis=2)
    union = jnp.sum(p, axis=2) + jnp.sum(onehot, axis=2)
    dice = (2.0 * inter + smooth) / (union + smooth)
    return 1.0 - jnp.mean(dice)


if __name__ == "__main__":
    key = jax.random.PRNGKey(0)
    ks = jax.random.split(key, 6)

    # Case 1: small shape from the module (B=2, C=4, 16x16); single tile,
    # no masking, auto tile pick.
    B, C, H, W = 2, 4, 16, 16
    logits = jax.random.normal(ks[0], (B, C, H, W), dtype=jnp.float32)
    labels = jax.random.randint(ks[1], (B, H, W), 0, C, dtype=jnp.int32)
    loss = dice_loss(logits, labels)
    jax.block_until_ready(loss)
    ref = _dice_loss_ref(logits, labels)
    assert jnp.allclose(loss, ref, atol=1e-5, rtol=1e-5), (loss, ref)

    # Case 2: N % 128 != 0 + ragged last block -> full tail-masking path
    # (N=5184 -> 41 rows of 128, s_tile=32 -> 2 grid steps, last one ragged).
    B, C, H, W = 2, 5, 72, 72
    logits = jax.random.normal(ks[2], (B, C, H, W), dtype=jnp.float32)
    labels = jax.random.randint(ks[3], (B, H, W), 0, C, dtype=jnp.int32)
    loss2 = dice_loss(logits, labels, s_tile=32)
    jax.block_until_ready(loss2)
    ref2 = _dice_loss_ref(logits, labels)
    assert jnp.allclose(loss2, ref2, atol=1e-5, rtol=1e-5), (loss2, ref2)

    # Case 3: B=1 -> spatial axis split across two parallel grid slots
    # (both v7x TensorCores), bf16 logits, mask-free path.
    B, C, H, W = 1, 4, 128, 128
    logits = jax.random.normal(ks[4], (B, C, H, W),
                               dtype=jnp.float32).astype(jnp.bfloat16)
    labels = jax.random.randint(ks[5], (B, H, W), 0, C, dtype=jnp.int32)
    loss3 = dice_loss(logits, labels, s_tile=32)
    jax.block_until_ready(loss3)
    ref3 = _dice_loss_ref(logits, labels)
    assert jnp.allclose(loss3, ref3, atol=1e-4, rtol=1e-4), (loss3, ref3)

    print("KERNEL_OK")
</pallas_src>

<mosaic_0001>
module attributes {stable_mosaic.version = 11 : i64} {
  func.func @_dice_partial_kernel(%arg0: i32, %arg1: i32, %arg2: i32, %arg3: memref<1x4x2x128xf32, #tpu.memory_space<vmem>>, %arg4: memref<1x2x128xi8, #tpu.memory_space<vmem>>, %arg5: memref<1x1x4x2x128xf32, #tpu.memory_space<vmem>>, %arg6: memref<1x1x4x2x128xf32, #tpu.memory_space<vmem>>, %arg7: memref<1x1x4x2x128xf32, #tpu.memory_space<vmem>>) attributes {dimension_semantics = [#tpu.dimension_semantics<parallel>, #tpu.dimension_semantics<parallel>, #tpu.dimension_semantics<arbitrary>], iteration_bounds = array<i64: 2, 1, 1>, scalar_prefetch = 0 : i64, scratch_operands = 0 : i64, tpu.core_type = #tpu.core_type<tc>, window_params = [{transform_indices = @transform_0, window_bounds = array<i64: 1, 4, 2, 128>}, {transform_indices = @transform_1, window_bounds = array<i64: 1, 2, 128>}, {transform_indices = @transform_2, window_bounds = array<i64: 1, 1, 4, 2, 128>}, {transform_indices = @transform_3, window_bounds = array<i64: 1, 1, 4, 2, 128>}, {transform_indices = @transform_4, window_bounds = array<i64: 1, 1, 4, 2, 128>}]} {
    %c0_i32 = arith.constant 0 : i32
    %0 = arith.cmpi eq, %arg2, %c0_i32 : i32
    %1 = arith.extui %0 : i1 to i32
    %c0_i32_0 = arith.constant 0 : i32
    %2 = arith.cmpi ne, %1, %c0_i32_0 : i32
    scf.if %2 {
      %cst_45 = arith.constant 0.000000e+00 : f32
      %52 = vector.broadcast %cst_45 : f32 to vector<1x1x4x2x128xf32>
      %c0_46 = arith.constant 0 : index
      %c0_47 = arith.constant 0 : index
      %c0_48 = arith.constant 0 : index
      %c0_49 = arith.constant 0 : index
      %c0_50 = arith.constant 0 : index
      %53 = vector.load %arg5[%c0_46, %c0_47, %c0_48, %c0_49, %c0_50] : memref<1x1x4x2x128xf32, #tpu.memory_space<vmem>>, vector<1x1x4x2x128xf32>
      tpu.vector_store %arg5[%c0_46, %c0_47, %c0_48, %c0_49, %c0_50], %52 {strides = array<i32>} : memref<1x1x4x2x128xf32, #tpu.memory_space<vmem>>, vector<1x1x4x2x128xf32>,
      %cst_51 = arith.constant 0.000000e+00 : f32
      %54 = vector.broadcast %cst_51 : f32 to vector<1x1x4x2x128xf32>
      %c0_52 = arith.constant 0 : index
      %c0_53 = arith.constant 0 : index
      %c0_54 = arith.constant 0 : index
      %c0_55 = arith.constant 0 : index
      %c0_56 = arith.constant 0 : index
      %55 = vector.load %arg6[%c0_52, %c0_53, %c0_54, %c0_55, %c0_56] : memref<1x1x4x2x128xf32, #tpu.memory_space<vmem>>, vector<1x1x4x2x128xf32>
      tpu.vector_store %arg6[%c0_52, %c0_53, %c0_54, %c0_55, %c0_56], %54 {strides = array<i32>} : memref<1x1x4x2x128xf32, #tpu.memory_space<vmem>>, vector<1x1x4x2x128xf32>,
      %cst_57 = arith.constant 0.000000e+00 : f32
      %56 = vector.broadcast %cst_57 : f32 to vector<1x1x4x2x128xf32>
      %c0_58 = arith.constant 0 : index
      %c0_59 = arith.constant 0 : index
      %c0_60 = arith.constant 0 : index
      %c0_61 = arith.constant 0 : index
      %c0_62 = arith.constant 0 : index
      %57 = vector.load %arg7[%c0_58, %c0_59, %c0_60, %c0_61, %c0_62] : memref<1x1x4x2x128xf32, #tpu.memory_space<vmem>>, vector<1x1x4x2x128xf32>
      tpu.vector_store %arg7[%c0_58, %c0_59, %c0_60, %c0_61, %c0_62], %56 {strides = array<i32>} : memref<1x1x4x2x128xf32, #tpu.memory_space<vmem>>, vector<1x1x4x2x128xf32>,
    } else {
    }
    %c0 = arith.constant 0 : index
    %c0_1 = arith.constant 0 : index
    %c0_2 = arith.constant 0 : index
    %c0_3 = arith.constant 0 : index
    %3 = vector.load %arg3[%c0, %c0_1, %c0_2, %c0_3] : memref<1x4x2x128xf32, #tpu.memory_space<vmem>>, vector<1x4x2x128xf32>
    %4 = vector.shape_cast %3 : vector<1x4x2x128xf32> to vector<4x2x128xf32>
    %c0_4 = arith.constant 0 : index
    %c0_5 = arith.constant 0 : index
    %c0_6 = arith.constant 0 : index
    %5 = vector.load %arg4[%c0_4, %c0_5, %c0_6] : memref<1x2x128xi8, #tpu.memory_space<vmem>>, vector<1x2x128xi8>
    %6 = vector.shape_cast %5 : vector<1x2x128xi8> to vector<2x128xi8>
    %7 = arith.extsi %6 : vector<2x128xi8> to vector<2x128xi32>
    %cst = arith.constant dense<0xFF800000> : vector<2x128xf32>
    %8 = vector.multi_reduction <maximumf>, %4, %cst [0] : vector<4x2x128xf32> to vector<2x128xf32>
    %9 = vector.shape_cast %8 : vector<2x128xf32> to vector<1x2x128xf32>
    %10 = vector.broadcast %9 : vector<1x2x128xf32> to vector<4x2x128xf32>
    %11 = arith.subf %4, %10 : vector<4x2x128xf32>
    %12 = math.exp %11 : vector<4x2x128xf32>
    %cst_7 = arith.constant dense<0.000000e+00> : vector<2x128xf32>
    %13 = vector.multi_reduction <add>, %12, %cst_7 [0] : vector<4x2x128xf32> to vector<2x128xf32>
    %cst_8 = arith.constant 1.000000e+00 : f32
    %14 = vector.broadcast %cst_8 : f32 to vector<2x128xf32>
    %15 = arith.divf %14, %13 : vector<2x128xf32>
    %16 = vector.shape_cast %15 : vector<2x128xf32> to vector<1x2x128xf32>
    %17 = vector.broadcast %16 : vector<1x2x128xf32> to vector<4x2x128xf32>
    %18 = arith.mulf %12, %17 : vector<4x2x128xf32>
    %19 = tpu.iota {dimensions = array<i32: 0>} : vector<4x2x128xi32>
    %20 = vector.shape_cast %7 : vector<2x128xi32> to vector<1x2x128xi32>
    %21 = vector.broadcast %20 : vector<1x2x128xi32> to vector<4x2x128xi32>
    %22 = arith.cmpi eq, %19, %21 : vector<4x2x128xi32>
    %c0_9 = arith.constant 0 : index
    %c0_10 = arith.constant 0 : index
    %c0_11 = arith.constant 0 : index
    %c0_12 = arith.constant 0 : index
    %c0_13 = arith.constant 0 : index
    %23 = vector.load %arg5[%c0_9, %c0_10, %c0_11, %c0_12, %c0_13] : memref<1x1x4x2x128xf32, #tpu.memory_space<vmem>>, vector<1x1x4x2x128xf32>
    %24 = vector.shape_cast %23 : vector<1x1x4x2x128xf32> to vector<4x2x128xf32>
    %cst_14 = arith.constant 0.000000e+00 : f32
    %25 = vector.broadcast %cst_14 : f32 to vector<4x2x128xf32>
    %26 = arith.select %22, %18, %25 : vector<4x2x128xi1>, vector<4x2x128xf32>
    %27 = vector.shape_cast %26 : vector<4x2x128xf32> to vector<4x1x2x128xf32>
    %cst_15 = arith.constant dense<0.000000e+00> : vector<4x2x128xf32>
    %28 = vector.multi_reduction <add>, %27, %cst_15 [1] : vector<4x1x2x128xf32> to vector<4x2x128xf32>
    %29 = arith.addf %24, %28 : vector<4x2x128xf32>
    %c0_16 = arith.constant 0 : index
    %c0_17 = arith.constant 0 : index
    %c0_18 = arith.constant 0 : index
    %c0_19 = arith.constant 0 : index
    %c0_20 = arith.constant 0 : index
    %30 = vector.load %arg5[%c0_16, %c0_17, %c0_18, %c0_19, %c0_20] : memref<1x1x4x2x128xf32, #tpu.memory_space<vmem>>, vector<1x1x4x2x128xf32>
    %31 = vector.shape_cast %30 : vector<1x1x4x2x128xf32> to vector<4x2x128xf32>
    %32 = vector.shape_cast %29 : vector<4x2x128xf32> to vector<1x1x4x2x128xf32>
    tpu.vector_store %arg5[%c0_16, %c0_17, %c0_18, %c0_19, %c0_20], %32 {strides = array<i32>} : memref<1x1x4x2x128xf32, #tpu.memory_space<vmem>>, vector<1x1x4x2x128xf32>,
    %c0_21 = arith.constant 0 : index
    %c0_22 = arith.constant 0 : index
    %c0_23 = arith.constant 0 : index
    %c0_24 = arith.constant 0 : index
    %c0_25 = arith.constant 0 : index
    %33 = vector.load %arg6[%c0_21, %c0_22, %c0_23, %c0_24, %c0_25] : memref<1x1x4x2x128xf32, #tpu.memory_space<vmem>>, vector<1x1x4x2x128xf32>
    %34 = vector.shape_cast %33 : vector<1x1x4x2x128xf32> to vector<4x2x128xf32>
    %35 = vector.shape_cast %18 : vector<4x2x128xf32> to vector<4x1x2x128xf32>
    %cst_26 = arith.constant dense<0.000000e+00> : vector<4x2x128xf32>
    %36 = vector.multi_reduction <add>, %35, %cst_26 [1] : vector<4x1x2x128xf32> to vector<4x2x128xf32>
    %37 = arith.addf %34, %36 : vector<4x2x128xf32>
    %c0_27 = arith.constant 0 : index
    %c0_28 = arith.constant 0 : index
    %c0_29 = arith.constant 0 : index
    %c0_30 = arith.constant 0 : index
    %c0_31 = arith.constant 0 : index
    %38 = vector.load %arg6[%c0_27, %c0_28, %c0_29, %c0_30, %c0_31] : memref<1x1x4x2x128xf32, #tpu.memory_space<vmem>>, vector<1x1x4x2x128xf32>
    %39 = vector.shape_cast %38 : vector<1x1x4x2x128xf32> to vector<4x2x128xf32>
    %40 = vector.shape_cast %37 : vector<4x2x128xf32> to vector<1x1x4x2x128xf32>
    tpu.vector_store %arg6[%c0_27, %c0_28, %c0_29, %c0_30, %c0_31], %40 {strides = array<i32>} : memref<1x1x4x2x128xf32, #tpu.memory_space<vmem>>, vector<1x1x4x2x128xf32>,
    %c0_32 = arith.constant 0 : index
    %c0_33 = arith.constant 0 : index
    %c0_34 = arith.constant 0 : index
    %c0_35 = arith.constant 0 : index
    %c0_36 = arith.constant 0 : index
    %41 = vector.load %arg7[%c0_32, %c0_33, %c0_34, %c0_35, %c0_36] : memref<1x1x4x2x128xf32, #tpu.memory_space<vmem>>, vector<1x1x4x2x128xf32>
    %42 = vector.shape_cast %41 : vector<1x1x4x2x128xf32> to vector<4x2x128xf32>
    %cst_37 = arith.constant 1.000000e+00 : f32
    %cst_38 = arith.constant 0.000000e+00 : f32
    %43 = vector.broadcast %cst_37 : f32 to vector<4x2x128xf32>
    %44 = vector.broadcast %cst_38 : f32 to vector<4x2x128xf32>
    %45 = arith.select %22, %43, %44 : vector<4x2x128xi1>, vector<4x2x128xf32>
    %46 = vector.shape_cast %45 : vector<4x2x128xf32> to vector<4x1x2x128xf32>
    %cst_39 = arith.constant dense<0.000000e+00> : vector<4x2x128xf32>
    %47 = vector.multi_reduction <add>, %46, %cst_39 [1] : vector<4x1x2x128xf32> to vector<4x2x128xf32>
    %48 = arith.addf %42, %47 : vector<4x2x128xf32>
    %c0_40 = arith.constant 0 : index
    %c0_41 = arith.constant 0 : index
    %c0_42 = arith.constant 0 : index
    %c0_43 = arith.constant 0 : index
    %c0_44 = arith.constant 0 : index
    %49 = vector.load %arg7[%c0_40, %c0_41, %c0_42, %c0_43, %c0_44] : memref<1x1x4x2x128xf32, #tpu.memory_space<vmem>>, vector<1x1x4x2x128xf32>
    %50 = vector.shape_cast %49 : vector<1x1x4x2x128xf32> to vector<4x2x128xf32>
    %51 = vector.shape_cast %48 : vector<4x2x128xf32> to vector<1x1x4x2x128xf32>
    tpu.vector_store %arg7[%c0_40, %c0_41, %c0_42, %c0_43, %c0_44], %51 {strides = array<i32>} : memref<1x1x4x2x128xf32, #tpu.memory_space<vmem>>, vector<1x1x4x2x128xf32>,
    return
  }
  func.func @transform_0(%arg0: i32, %arg1: i32, %arg2: i32) -> (i32, i32, i32, i32) {
    %c1_i32 = arith.constant 1 : i32
    %0 = arith.muli %arg1, %c1_i32 : i32
    %1 = arith.addi %0, %arg2 : i32
    %c0_i32 = arith.constant 0 : i32
    %c0_i32_0 = arith.constant 0 : i32
    %c0_i32_1 = arith.constant 0 : i32
    return %arg0, %c0_i32, %1, %c0_i32_0 : i32, i32, i32, i32
  }
  func.func @transform_1(%arg0: i32, %arg1: i32, %arg2: i32) -> (i32, i32, i32) {
    %c1_i32 = arith.constant 1 : i32
    %0 = arith.muli %arg1, %c1_i32 : i32
    %1 = arith.addi %0, %arg2 : i32
    %c0_i32 = arith.constant 0 : i32
    %c0_i32_0 = arith.constant 0 : i32
    return %arg0, %1, %c0_i32 : i32, i32, i32
  }
  func.func @transform_2(%arg0: i32, %arg1: i32, %arg2: i32) -> (i32, i32, i32, i32, i32) {
    %c0_i32 = arith.constant 0 : i32
    %c0_i32_0 = arith.constant 0 : i32
    %c0_i32_1 = arith.constant 0 : i32
    %c0_i32_2 = arith.constant 0 : i32
    return %arg0, %arg1, %c0_i32, %c0_i32_0, %c0_i32_1 : i32, i32, i32, i32, i32
  }
  func.func @transform_3(%arg0: i32, %arg1: i32, %arg2: i32) -> (i32, i32, i32, i32, i32) {
    %c0_i32 = arith.constant 0 : i32
    %c0_i32_0 = arith.constant 0 : i32
    %c0_i32_1 = arith.constant 0 : i32
    %c0_i32_2 = arith.constant 0 : i32
    return %arg0, %arg1, %c0_i32, %c0_i32_0, %c0_i32_1 : i32, i32, i32, i32, i32
  }
  func.func @transform_4(%arg0: i32, %arg1: i32, %arg2: i32) -> (i32, i32, i32, i32, i32) {
    %c0_i32 = arith.constant 0 : i32
    %c0_i32_0 = arith.constant 0 : i32
    %c0_i32_1 = arith.constant 0 : i32
    %c0_i32_2 = arith.constant 0 : i32
    return %arg0, %arg1, %c0_i32, %c0_i32_0, %c0_i32_1 : i32, i32, i32, i32, i32
  }
}

</mosaic_0001>

<bundles_post_ra>
// kernel: tpu_custom_call.1
= control target key start
LH: loop header
LB: loop body
LE: loop exit
PB: predicated region body
PF: predicated region fallthrough
CT: control target
= control target key end

     0   :  { %s1306_s0 = inlined_call_operand.hbm [shape: f32[2,4,2,128], index: 0, kind: input, shape index: {}]   ;;  %s1307_s1 = inlined_call_operand.vmem [shape: s8[2,2,128], index: 1, kind: input, shape index: {}]   ;;  %s1308_s2 = inlined_call_operand.hbm [shape: f32[2,1,4,2,128], index: 2, kind: output, shape index: {0}]   ;;  %s1309_s3 = inlined_call_operand.hbm [shape: f32[2,1,4,2,128], index: 3, kind: output, shape index: {1}]   ;;  %s1310_s4 = inlined_call_operand.hbm [shape: f32[2,1,4,2,128], index: 4, kind: output, shape index: {2}]  }
   0x1   :  { %1313 = sst [smem:[#allocation12_spill]] %s1306_s0 }
   0x2   :  { %10 = vsyncpa [#allocation3], 0 }
   0x3   :  { %12 = vsyncpa [#allocation3 + $0x1], 0 }
   0x4   :  { %13 = vsyncpa [#allocation4], 0 }
   0x5   :  { %15 = vsyncpa [#allocation4 + $0x1], 0 }
   0x6   :  { %16 = vsyncpa [#allocation7], 0 }
   0x7   :  { %18 = vsyncpa [#allocation7 + $0x1], 0  ;;  %s966_s15 = smov 0   ;;  %s968_s16 = smov 0  }
   0x8   :  { %s970_s17 = smov 0   ;;  %s972_s18 = smov 0  }
   0x9   :  { %s974_s19 = smov 0   ;;  %s976_s20 = smov 0  }
   0xa LB: > { %s997_s21 = sadd.s32 4294967295, %s930_s20   ;;  %s1312_s22 = sadd.s32 4294967294, %s930_s20   ;;  %s930_s20 = sphi %s976_s20, %s24_s20   ;;  %s926_s19 = sphi %s974_s19, %s1329_s19   ;;  %s922_s18 = sphi %s972_s18, %s1328_s18   ;;  %s918_s17 = sphi %s970_s17, %s1327_s17   ;;  %s914_s16 = sphi %s968_s16, %s1326_s16   ;;  %s910_s15 = sphi %s966_s15, %s1325_s15  }
   0xb   : > { %s43_s23 = sadd.s32 1, %s926_s19  ;;  %s54_s24 = sadd.s32 1, %s918_s17 }
   0xc   : > { %p45_p0 = scmp.ge.s32.totalorder %s43_s23, 2  ;;  %p61_p1 = scmp.ne.s32.totalorder %s918_s17, %s914_s16 }
   0xd   : > { %p62_p2 = scmp.eq.s32.totalorder %s930_s20, 0  ;;  %p67_p3 = scmp.ne.s32.totalorder %s914_s16, %s910_s15 }
   0xe   : > { %s1331_s23 = smov (%p45_p0, %s43_s23), 0  ;;  %p68_p5 = scmp.eq.s32.totalorder %s997_s21, 0 }
   0xf   : > { %p1009_p4 = por %p62_p2, %p61_p1  ;;  %s49_s26 = ssub.s32 %s926_s19, %s1331_s23 }
  0x10   : > { %p123_p6 = scmp.eq.s32.totalorder %s997_s21, 1  ;;  %p52_p7 = scmp.eq.s32.totalorder %s49_s26, 0 }
  0x11   : > { %p1017_p8 = por %p68_p5, %p67_p3  ;;  %p129_p10 = scmp.eq.s32.totalorder %s1312_s22, 1 }
  0x12   : > { %p1021_p9 = por %p123_p6, %p61_p1  ;;  %p693_p13 = scmp.lt.s32.totalorder %s930_s20, 2 }
  0x13   : > { %s1028_s29 = scalar_select %p52_p7, %s918_s17, %s54_s24  }
  0x14   : > { %s1316_s28 = scalar_select %p1021_p9, 1, 0 }
  0x15   : > { %p1030_p11 = por %p129_p10, %p67_p3  ;;  %s205_s5 = sand.u32 1, %s918_s17  }
  0x16   : > { %s648_s6 = sshll.u32 %s205_s5, 3  ;;  %s667_s7 = sshll.u32 %s926_s19, 7 }
  0x17   : > { %s1317_s30 = scalar_select %p1030_p11, 1, 0 }
  0x18   : > { %s1318_s0 = sld [smem:[#allocation12_spill]]  ;;  %s209_s11 = scalar_lea.vmem [#allocation2], %s648_s6 }
  0x19   : > { %s218_s12 = sshll.u32 %s209_s11, 4  ;;  %p1047_p0 = pnand %p693_p13, %p1009_p4  ;;  %s1043_s12 = int_to_ptr.vmem [resolvable:$true] %s218_s12 }
  0x1a   : > { %s1052_s14 = scalar_lea.sflag [#allocation3], %s205_s5 }
  0x1b   : > { %p760_p3 = pneg %p1047_p0 }
  0x1e   : > { %s1041_s10 = scalar_lea.hbm %s1318_s0, %s667_s7  ;;  %s763_s25 = scalar_lea.hbm %s1318_s0, 256 }
  0x1f   : > { %s758_s24 = scalar_lea.hbm %s1041_s10, 128  ;;  %p764_p4 = scmp.lt.u32.totalorder %s1041_s10, %s1318_s0 }
  0x20   : > { %p759_p2 = scmp.ne.s32.totalorder %s1041_s10, %s758_s24  ;;  %p765_p7 = scmp.lt.u32.totalorder %s763_s25, %s758_s24 }
  0x21   : > { %p767_p13 = scmp.lt.u32.totalorder %s758_s24, %s1041_s10 }
  0x22   : > { %p761_p5 = pnand %p760_p3, %p759_p2  ;;  %p766_p10 = por %p765_p7, %p764_p4 }
  0x24   : > { %p762_p6 = pneg %p761_p5  ;;  %p768_p12 = por %p767_p13, %p766_p10 }
  0x26   : > { %p769_p1 = pnand %p768_p12, %p762_p6 }
  0x28   : > { %772 = shalt.err (!%p769_p1)
}
  0x29   : > { %s773_s5 = scalar_lea.vmem %s1043_s12, 128  ;;  %s932_s9 = smov [#allocation2]  }
  0x2a   : > { %p774_p2 = scmp.ne.s32.totalorder %s1043_s12, %s773_s5  ;;  %s778_s11 = sshll.u32 %s932_s9, 4  ;;  %s779_s11 = int_to_ptr.vmem [resolvable:$false] %s778_s11 }
  0x2b   : > { %s780_s26 = scalar_lea.vmem %s779_s11, 256  ;;  %p781_p9 = scmp.lt.s32.totalorder %s1043_s12, %s779_s11 }
  0x2c   : > { %p776_p5 = pnand %p774_p2, %p760_p3  ;;  %p782_p4 = scmp.lt.s32.totalorder %s780_s26, %s773_s5 }
  0x2e   : > { %p777_p11 = pneg %p776_p5  ;;  %p783_p7 = por %p782_p4, %p781_p9 }
  0x30   : > { %p784_p10 = pnand %p783_p7, %p777_p11 }
  0x32   : > { %787 = shalt.err (!%p784_p10)
}
  0x33   : > { %s933_s24 = smov 32   ;;  %s934_s6 = smov 2  }
  0x34   : > { %682 = dma.hbm_to_vmem [thread:$0]  (!%p1047_p0), %s1041_s10, 128, %s1043_s12, %s1052_s14, %s933_s24, %s933_s24, %s934_s6  }
  0x35   : > { %p237_p12 = scmp.lt.s32.totalorder %s930_s20, 3  ;;  %p1320_p1 = scmp.ge.s32.totalorder %s930_s20, 1 }
  0x37   : > { %p238_p3 = pnand %p1320_p1, %p237_p12 }
  0x38   : > { %s1084_s25 = sand.u32 (!%p238_p3), 1, %s914_s16  }
  0x39   : > { %241 = sbr.rel (%p238_p3) target bundleno = 184 (0xb8), region = 28  ;;  %s652_s7 = sshll.u32 (!%p238_p3), %s1084_s25, 3 }
  0x3a   : > { %s244_s8 = scalar_lea.sflag (!%p238_p3), [#allocation3], %s1084_s25  ;;  %s247_s5 = scalar_lea.vmem (!%p238_p3), [#allocation2], %s652_s7 }
  0x40   : > { %897 = dma.done.wait (%p1017_p8), %s244_s8, 128  }
  0x41   : > { %899 = vsyncadd (%p1017_p8), %s244_s8, 4294967168  ;;  %s1092_s10 = scalar_lea.vmem [#allocation6], %s652_s7  ;;  %v935_v0 = vmov 0.0   ;;  %s1098_s12 = scalar_lea.vmem [#allocation5], %s652_s7  ;;  %vm320_vm0 = vcmask 1041408  }
  0x42   : > { %306 = vst [vmem:[%s1092_s10] sm:$0x3] %v935_v0  ;;  %307 = vst [vmem:[%s1092_s10 + $0x2] sm:$0x3] %v935_v0  ;;  %p291_p8 = scmp.lt.s32.totalorder %s922_s18, 1  ;;  %s1105_s27 = scalar_lea.vmem [#allocation8], %s652_s7 }
  0x43   : > { %308 = vst [vmem:[%s1092_s10 + $0x4] sm:$0x3] %v935_v0  ;;  %309 = vst [vmem:[%s1092_s10 + $0x6] sm:$0x3] %v935_v0  ;;  %v314_v1 = vld [vmem:[%s247_s5] sm:$0x3] }
  0x44   : > { %302 = vst [vmem:[%s1098_s12] sm:$0x3] %v935_v0  ;;  %303 = vst [vmem:[%s1098_s12 + $0x2] sm:$0x3] %v935_v0  ;;  %s292_s13 = scalar_select %p291_p8, %s922_s18, 1  ;;  %v315_v2 = vld [vmem:[%s247_s5 + $0x2] sm:$0x3] }
  0x45   : > { %304 = vst [vmem:[%s1098_s12 + $0x4] sm:$0x3] %v935_v0  ;;  %305 = vst [vmem:[%s1098_s12 + $0x6] sm:$0x3] %v935_v0  ;;  %v316_v3 = vld [vmem:[%s247_s5 + $0x4] sm:$0x3] }
  0x46   : > { %310 = vst [vmem:[%s1105_s27] sm:$0x3] %v935_v0  ;;  %311 = vst [vmem:[%s1105_s27 + $0x2] sm:$0x3] %v935_v0  ;;  %s296_s11 = scalar_lea.vmem %s1307_s1, %s292_s13  ;;  %v317_v4 = vld [vmem:[%s247_s5 + $0x6] sm:$0x3]  ;;  %v321_v5 = vsel %vm320_vm0, %v314_v1, -inf }
  0x47   : > { %312 = vst [vmem:[%s1105_s27 + $0x4] sm:$0x3] %v935_v0  ;;  %313 = vst [vmem:[%s1105_s27 + $0x6] sm:$0x3] %v935_v0  ;;  %v322_v6 = vsel %vm320_vm0, %v315_v2, -inf  ;;  %v323_v7 = vsel %vm320_vm0, %v316_v3, -inf }
  0x48   : > { %v324_v8 = vsel %vm320_vm0, %v317_v4, -inf  ;;  %v325_v9 = vmax.f32 %v321_v5, %v322_v6  ;;  %v318_v11 = vld [vmem:[%s296_s11] sm:$0x1]  ;;  %s418_s26 = sand.u32 1, %s997_s21   ;;  %s1147_s24 = sshll.u32 %s922_s18, 7 }
  0x49   : > { %v326_v10 = vmax.f32 %v323_v7, %v324_v8  ;;  %v1119_v12 = vunpack.c.0.s8 %v318_v11  ;;  %v377_v45 = vld [vmem:[%s1092_s10] sm:$0x3]  ;;  %s457_s6 = sshll.u32 %s1092_s10, 4  ;;  %v378_v47 = vld [vmem:[%s1092_s10 + $0x2] sm:$0x3]  ;;  %s439_s7 = sshll.u32 %s1098_s12, 4  ;;  %s1166_s6 = int_to_ptr.vmem [resolvable:$true] %s457_s6  ;;  %s1194_s7 = int_to_ptr.vmem [resolvable:$true] %s439_s7 }
  0x4a   : > { %v379_v48 = vld [vmem:[%s1092_s10 + $0x4] sm:$0x3]  ;;  %v380_v49 = vld [vmem:[%s1092_s10 + $0x6] sm:$0x3]  ;;  %s475_s8 = sshll.u32 %s1105_s27, 4  ;;  %s1164_s13 = scalar_lea.hbm %s1309_s3, %s1147_s24  ;;  %s1182_s8 = int_to_ptr.vmem [resolvable:$true] %s475_s8 }
  0x4b   : > { %v327_v13 = vmax.f32 %v325_v9, %v326_v10  ;;  %vm353_vm1 = vcmp.eq.s32.totalorder %v1119_v12, 0  ;;  %vm354_vm2 = vcmp.eq.s32.totalorder %v1119_v12, 1  ;;  %vm355_vm3 = vcmp.eq.s32.totalorder %v1119_v12, 2  ;;  %v357_v54 = vld [vmem:[%s1098_s12] sm:$0x3]  ;;  %s1172_s9 = scalar_lea.hbm %s1310_s4, %s1147_s24  ;;  %s1192_s5 = scalar_lea.hbm %s1308_s2, %s1147_s24 }
  0x4c   : > { %vm356_vm4 = vcmp.eq.s32.totalorder %v1119_v12, 3  ;;  %v397_v22 = vsel %vm353_vm1, 1.0, %v935_v0  ;;  %v398_v23 = vsel %vm354_vm2, 1.0, %v935_v0  ;;  %v399_v24 = vsel %vm355_vm3, 1.0, %v935_v0  ;;  %v358_v55 = vld [vmem:[%s1098_s12 + $0x2] sm:$0x3] }
  0x4d   : > { %v393_v14 = vld [vmem:[%s1105_s27] sm:$0x3]  ;;  %v328_v15 = vsub.f32 %v314_v1, %v327_v13  ;;  %v329_v16 = vsub.f32 %v315_v2, %v327_v13  ;;  %v330_v17 = vsub.f32 %v316_v3, %v327_v13  ;;  %v331_v18 = vsub.f32 %v317_v4, %v327_v13  ;;  %v394_v19 = vld [vmem:[%s1105_s27 + $0x2] sm:$0x3]  ;;  %v359_v56 = vld [vmem:[%s1098_s12 + $0x4] sm:$0x3] }
  0x4e   : > { %v395_v20 = vld [vmem:[%s1105_s27 + $0x4] sm:$0x3]  ;;  %v396_v21 = vld [vmem:[%s1105_s27 + $0x6] sm:$0x3]  ;;  %v400_v25 = vsel %vm356_vm4, 1.0, %v935_v0  ;;  %v405_v29 = vadd.f32 %v397_v22, %v393_v14  ;;  %v406_v31 = vadd.f32 %v398_v23, %v394_v19  ;;  %s788_s14 = scalar_lea.vmem %s1166_s6, 128 }
  0x4f   : > { %v332_v26 = vmul.f32 1.442695, %v328_v15  ;;  %v334_v27 = vmul.f32 1.442695, %v329_v16  ;;  %v336_v28 = vmul.f32 1.442695, %v330_v17  ;;  %v407_v32 = vadd.f32 %v399_v24, %v395_v20  ;;  %p789_p9 = scmp.ne.s32.totalorder %s1166_s6, %s788_s14 }
  0x50   : > { %v338_v30 = vmul.f32 1.442695, %v331_v18  ;;  %v408_v33 = vadd.f32 %v400_v25, %v396_v21  ;;  %409 = vst [vmem:[%s1105_s27] sm:$0x3] %v405_v29  ;;  %410 = vst [vmem:[%s1105_s27 + $0x2] sm:$0x3] %v406_v31  ;;  %p1321_p11 = scmp.ne.s32.totalorder %s1316_s28, 0 }
  0x51   : > { %748 = vpow2.f32 %v332_v26  ;;  %411 = vst [vmem:[%s1105_s27 + $0x4] sm:$0x3] %v407_v32  ;;  %v360_v57 = vld [vmem:[%s1098_s12 + $0x6] sm:$0x3] }
  0x52   : > { %750 = vpow2.f32 %v334_v27  ;;  %412 = vst [vmem:[%s1105_s27 + $0x6] sm:$0x3] %v408_v33  ;;  %s1198_s27 = scalar_lea.sflag [#allocation7], %s418_s26  ;;  %p790_p0 = pnand %p789_p9, %p1321_p11 }
  0x53   : > { %752 = vpow2.f32 %v336_v28 }
  0x54   : > { %754 = vpow2.f32 %v338_v30  ;;  %p791_p6 = pneg %p790_p0 }
  0x5b   : > { %v749_v34 = vpop.eup %748 }
  0x5c   : > { %v751_v35 = vpop.eup %750  ;;  %v340_v36 = vsel %vm320_vm0, %v749_v34, 0.0 }
  0x5d   : > { %v753_v37 = vpop.eup %752  ;;  %v341_v38 = vsel %vm320_vm0, %v751_v35, 0.0 }
  0x5e   : > { %v755_v39 = vpop.eup %754  ;;  %v342_v40 = vadd.f32 %v341_v38, %v340_v36  ;;  %v343_v41 = vsel %vm320_vm0, %v753_v37, 0.0 }
  0x5f   : > { %v345_v42 = vsel %vm320_vm0, %v755_v39, 0.0 }
  0x60   : > { %v344_v43 = vadd.f32 %v343_v41, %v342_v40 }
  0x62   : > { %v346_v44 = vadd.f32 %v345_v42, %v344_v43 }
  0x64   : > { %756 = vrcp.f32 %v346_v44 }
  0x6e   : > { %v757_v46 = vpop.eup %756 }
  0x6f   : > { %v349_v50 = vmul.f32 %v757_v46, %v749_v34  ;;  %v350_v51 = vmul.f32 %v757_v46, %v751_v35  ;;  %v351_v52 = vmul.f32 %v757_v46, %v753_v37  ;;  %v352_v53 = vmul.f32 %v757_v46, %v755_v39 }
  0x71   : > { %v385_v58 = vadd.f32 %v377_v45, %v349_v50  ;;  %v386_v59 = vadd.f32 %v378_v47, %v350_v51  ;;  %v387_v60 = vadd.f32 %v379_v48, %v351_v52  ;;  %v388_v61 = vadd.f32 %v380_v49, %v352_v53 }
  0x72   : > { %v361_v62 = vsel %vm353_vm1, %v349_v50, 0.0  ;;  %v362_v63 = vsel %vm354_vm2, %v350_v51, 0.0  ;;  %v363_v0 = vsel %vm355_vm3, %v351_v52, 0.0  ;;  %v364_v1 = vsel %vm356_vm4, %v352_v53, 0.0 }
  0x73   : > { %389 = vst [vmem:[%s1092_s10] sm:$0x3] %v385_v58  ;;  %390 = vst [vmem:[%s1092_s10 + $0x2] sm:$0x3] %v386_v59  ;;  %v369_v2 = vadd.f32 %v361_v62, %v357_v54  ;;  %v370_v3 = vadd.f32 %v362_v63, %v358_v55  ;;  %v371_v4 = vadd.f32 %v363_v0, %v359_v56 }
  0x74   : > { %391 = vst [vmem:[%s1092_s10 + $0x4] sm:$0x3] %v387_v60  ;;  %392 = vst [vmem:[%s1092_s10 + $0x6] sm:$0x3] %v388_v61  ;;  %v372_v5 = vadd.f32 %v364_v1, %v360_v57  ;;  %s936_s10 = smov [#allocation6]  }
  0x75   : > { %s792_s22 = sshll.u32 %s936_s10, 4  ;;  %s793_s22 = int_to_ptr.vmem [resolvable:$false] %s792_s22 }
  0x76   : > { %s794_s0 = scalar_lea.vmem %s793_s22, 256  ;;  %p795_p13 = scmp.lt.s32.totalorder %s1166_s6, %s793_s22 }
  0x77   : > { %p796_p2 = scmp.lt.s32.totalorder %s794_s0, %s788_s14 }
  0x79   : > { %p797_p5 = por %p796_p2, %p795_p13 }
  0x7b   : > { %p798_p4 = pnand %p797_p5, %p791_p6 }
  0x7d   : > { %801 = shalt.err (!%p798_p4)
}
  0x7e   : > { %s802_s21 = scalar_lea.hbm %s1164_s13, 128  ;;  %s806_s11 = scalar_lea.hbm %s1309_s3, 256 }
  0x7f   : > { %p803_p7 = scmp.ne.s32.totalorder %s1164_s13, %s802_s21  ;;  %p807_p1 = scmp.lt.u32.totalorder %s1164_s13, %s1309_s3 }
  0x80   : > { %p808_p3 = scmp.lt.u32.totalorder %s806_s11, %s802_s21  ;;  %p810_p9 = scmp.lt.u32.totalorder %s802_s21, %s1164_s13 }
  0x81   : > { %p804_p10 = pnand %p803_p7, %p1321_p11 }
  0x82   : > { %p809_p8 = por %p808_p3, %p807_p1 }
  0x83   : > { %p805_p12 = pneg %p804_p10 }
  0x84   : > { %p811_p0 = por %p810_p9, %p809_p8 }
  0x86   : > { %p812_p6 = pnand %p811_p0, %p805_p12 }
  0x88   : > { %815 = shalt.err (!%p812_p6)
}
  0x89   : > { %s937_s0 = smov 32   ;;  %s938_s14 = smov 2   ;;  %373 = vst [vmem:[%s1098_s12] sm:$0x3] %v369_v2  ;;  %374 = vst [vmem:[%s1098_s12 + $0x2] sm:$0x3] %v370_v3 }
  0x8a   : > { %674 = dma.vmem_to_hbm [thread:$0]  (%p1321_p11), %s1166_s6, 128, %s1164_s13, %s1198_s27, %s937_s0, %s937_s0, %s938_s14  }
  0x8b   : > { %375 = vst [vmem:[%s1098_s12 + $0x4] sm:$0x3] %v371_v4  ;;  %376 = vst [vmem:[%s1098_s12 + $0x6] sm:$0x3] %v372_v5  ;;  %s816_s10 = scalar_lea.vmem %s1182_s8, 128  ;;  %s939_s21 = smov [#allocation8]  }
  0x8c   : > { %p817_p13 = scmp.ne.s32.totalorder %s1182_s8, %s816_s10  ;;  %s820_s26 = sshll.u32 %s939_s21, 4  ;;  %s821_s26 = int_to_ptr.vmem [resolvable:$false] %s820_s26 }
  0x8d   : > { %s822_s24 = scalar_lea.vmem %s821_s26, 256  ;;  %p823_p4 = scmp.lt.s32.totalorder %s1182_s8, %s821_s26 }
  0x8e   : > { %p818_p2 = pnand %p817_p13, %p1321_p11  ;;  %p824_p7 = scmp.lt.s32.totalorder %s822_s24, %s816_s10 }
  0x90   : > { %p819_p5 = pneg %p818_p2  ;;  %p825_p10 = por %p824_p7, %p823_p4 }
  0x92   : > { %p826_p12 = pnand %p825_p10, %p819_p5 }
  0x94   : > { %829 = shalt.err (!%p826_p12)
}
  0x95   : > { %s830_s12 = scalar_lea.hbm %s1172_s9, 128  ;;  %s834_s11 = scalar_lea.hbm %s1310_s4, 256 }
  0x96   : > { %p831_p1 = scmp.ne.s32.totalorder %s1172_s9, %s830_s12  ;;  %p835_p9 = scmp.lt.u32.totalorder %s1172_s9, %s1310_s4 }
  0x97   : > { %p836_p0 = scmp.lt.u32.totalorder %s834_s11, %s830_s12  ;;  %p838_p13 = scmp.lt.u32.totalorder %s830_s12, %s1172_s9 }
  0x98   : > { %p832_p3 = pnand %p831_p1, %p1321_p11 }
  0x99   : > { %p837_p6 = por %p836_p0, %p835_p9 }
  0x9a   : > { %p833_p8 = pneg %p832_p3 }
  0x9b   : > { %p839_p2 = por %p838_p13, %p837_p6 }
  0x9d   : > { %p840_p5 = pnand %p839_p2, %p833_p8 }
  0x9f   : > { %843 = shalt.err (!%p840_p5)
}
  0xa0   : > { %675 = dma.vmem_to_hbm [thread:$0]  (%p1321_p11), %s1182_s8, 128, %s1172_s9, %s1198_s27, %s937_s0, %s937_s0, %s938_s14  }
  0xa1   : > { %s414_s10 = scalar_lea.sflag [#allocation4], %s1084_s25  ;;  %s844_s21 = scalar_lea.vmem %s1194_s7, 128 }
  0xa2   : > { %p845_p4 = scmp.ne.s32.totalorder %s1194_s7, %s844_s21  ;;  %s940_s26 = smov [#allocation5]  }
  0xa3   : > { %s848_s24 = sshll.u32 %s940_s26, 4  ;;  %s849_s24 = int_to_ptr.vmem [resolvable:$false] %s848_s24 }
  0xa4   : > { %p846_p7 = pnand %p845_p4, %p1321_p11  ;;  %s850_s12 = scalar_lea.vmem %s849_s24, 256 }
  0xa5   : > { %p851_p12 = scmp.lt.s32.totalorder %s1194_s7, %s849_s24  ;;  %p852_p1 = scmp.lt.s32.totalorder %s850_s12, %s844_s21 }
  0xa6   : > { %p847_p10 = pneg %p846_p7 }
  0xa7   : > { %p853_p3 = por %p852_p1, %p851_p12 }
  0xa9   : > { %p854_p8 = pnand %p853_p3, %p847_p10 }
  0xab   : > { %857 = shalt.err (!%p854_p8)
}
  0xac   : > { %s858_s8 = scalar_lea.hbm %s1192_s5, 128  ;;  %s862_s6 = scalar_lea.hbm %s1308_s2, 256 }
  0xad   : > { %p859_p9 = scmp.ne.s32.totalorder %s1192_s5, %s858_s8  ;;  %p863_p13 = scmp.lt.u32.totalorder %s1192_s5, %s1308_s2 }
  0xae   : > { %p864_p2 = scmp.lt.u32.totalorder %s862_s6, %s858_s8  ;;  %p866_p4 = scmp.lt.u32.totalorder %s858_s8, %s1192_s5 }
  0xaf   : > { %p860_p0 = pnand %p859_p9, %p1321_p11 }
  0xb0   : > { %p865_p5 = por %p864_p2, %p863_p13 }
  0xb1   : > { %p861_p6 = pneg %p860_p0 }
  0xb2   : > { %p867_p7 = por %p866_p4, %p865_p5 }
  0xb4   : > { %p868_p10 = pnand %p867_p7, %p861_p6 }
  0xb6   : > { %871 = shalt.err (!%p868_p10)
}
  0xb7   : > { %673 = dma.vmem_to_hbm [thread:$0]  (%p1321_p11), %s1194_s7, 128, %s1192_s5, %s414_s10, %s937_s0, %s937_s0, %s938_s14  }
  0xb8 PF: > { %s490_s18 = sand.u32 1, %s910_s15   ;;  %p1322_p12 = scmp.ne.s32.totalorder %s1317_s30, 0 }
  0xb9   : > { %p1323_p1 = scmp.ge.s32.totalorder %s930_s20, 2  ;;  %s491_s22 = scalar_lea.sflag [#allocation4], %s490_s18 }
  0xbb   : > { %p684_p3 = pnand %p1323_p1, %p1322_p12 }
  0xbd   : > { %901 = dma.done.wait (!%p684_p3), %s491_s22, 128  }
  0xbe   : > { %903 = vsyncadd (!%p684_p3), %s491_s22, 4294967168  ;;  %s1324_s28 = sadd.s32 4294967294, %s930_s20  }
  0xbf   : > { %s499_s21 = sand.u32 1, %s1324_s28  }
  0xc0   : > { %s500_s26 = scalar_lea.sflag [#allocation7], %s499_s21 }
  0xc1   : > { %905 = dma.done.wait (!%p684_p3), %s500_s26, 256  }
  0xc2   : > { %907 = vsyncadd (!%p684_p3), %s500_s26, 4294967040  ;;  %s24_s20 = sadd.s32 1, %s930_s20   ;;  %s1325_s15 = smov %s914_s16 }
  0xc3   : > { %p21_p11 = scmp.ge.s32.totalorder %s24_s20, 4   ;;  %s1326_s16 = smov %s918_s17 }
  0xc4   : > { %s1327_s17 = smov %s1028_s29  ;;  %s1328_s18 = smov %s926_s19 }
  0xc5   : > { %s1329_s19 = smov %s1331_s23  ;;  %23 = sbr.rel (!%p21_p11) target bundleno = 10 (0xa), region = 112 }
  0xcc   :  { %514 = vsyncpa [#allocation3], 1 }
  0xcd   :  { %516 = vsyncpa [#allocation3 + $0x1], 1 }
  0xce   :  { %517 = vsyncpa [#allocation4], 1 }
  0xcf   :  { %519 = vsyncpa [#allocation4 + $0x1], 1 }
  0xd0   :  { %520 = vsyncpa [#allocation7], 1 }
  0xd1   :  { %522 = vsyncpa [#allocation7 + $0x1], 1 }

</bundles_post_ra>
